<compile_context>
chip_gen: v5e
topology: v5e:2x2
jax: 0.10.0
libtpu: 0.0.40
codegen_flags: <defaults>
</compile_context>

<pallas_src>
import jax
import jax.numpy as jnp
from jax.experimental import pallas as pl
from jax.experimental.pallas import tpu as pltpu


def _lstm_chunk_kernel(gx_ref, whh_ref, o_ref, h_sc, c_sc):
    # gx_ref : (T, B, 4*Hp) f32   precomputed x @ W_ih^T + (b_ih + b_hh), gate-padded
    # whh_ref: (Hp, 4*Hp)   bf16  W_hh^T, gate-padded, resident in VMEM
    # o_ref  : (T, B, Hp)   f32   hidden states for this chunk of timesteps
    # h_sc/c_sc: (B, Hp)    f32   recurrent state carried across grid steps
    @pl.when(pl.program_id(0) == 0)
    def _():
        h_sc[...] = jnp.zeros_like(h_sc)
        c_sc[...] = jnp.zeros_like(c_sc)

    T = gx_ref.shape[0]
    Hp = h_sc.shape[-1]
    w = whh_ref[...]  # load once per chunk (resident weight)

    h = h_sc[...]
    c = c_sc[...]
    # Statically unrolled recurrence over the chunk (T is small and static),
    # keeping h/c in vector registers across the unrolled steps.
    for t in range(T):
        gates = gx_ref[t] + jnp.dot(
            h.astype(jnp.bfloat16), w, preferred_element_type=jnp.float32
        )  # (B, 4*Hp), f32 accumulation
        i_g = jax.nn.sigmoid(gates[:, 0 * Hp:1 * Hp])
        f_g = jax.nn.sigmoid(gates[:, 1 * Hp:2 * Hp])
        g_g = jnp.tanh(gates[:, 2 * Hp:3 * Hp])
        o_g = jax.nn.sigmoid(gates[:, 3 * Hp:4 * Hp])
        c = f_g * c + i_g * g_g
        h = o_g * jnp.tanh(c)
        o_ref[t] = h.astype(o_ref.dtype)  # lane-dense (Hp multiple of 128) store

    h_sc[...] = h
    c_sc[...] = c


def _round_up(x, m):
    return (x + m - 1) // m * m


def _pick_chunk(s, cap=8):
    for t in range(min(s, cap), 0, -1):
        if s % t == 0:
            return t
    return 1


def lstm_pallas(x, w_ih, w_hh, b_ih, b_hh, *, chunk_t=None):
    """x: (B, S, D) batch_first; weights in PyTorch LSTM layout:
       w_ih (4H, D), w_hh (4H, H), b_ih (4H,), b_hh (4H,).  Returns (B, S, H)."""
    B, S, D = x.shape
    H = w_hh.shape[1]
    Hp = _round_up(H, 128)                      # lane-pad each gate block
    T = _pick_chunk(S) if chunk_t is None else chunk_t
    assert S % T == 0, "sequence length must be divisible by the time chunk"

    x = x.astype(jnp.float32)
    bias = (b_ih + b_hh).astype(jnp.float32)

    # ---- Hoisted input projection: one big GEMM over all timesteps (XLA). ----
    gx = jnp.einsum("bsd,gd->bsg", x, w_ih.astype(jnp.float32)) + bias   # (B, S, 4H)
    # Gate-pad each H-wide block to Hp lanes, go time-major: (S, B, 4*Hp).
    gx = gx.reshape(B, S, 4, H)
    gx = jnp.pad(gx, ((0, 0), (0, 0), (0, 0), (0, Hp - H)))
    gx = jnp.transpose(gx, (1, 0, 2, 3)).reshape(S, B, 4 * Hp)

    # ---- W_hh^T, gate-padded, bf16 for the MXU (accumulation stays f32). ----
    whh = jnp.transpose(w_hh).astype(jnp.float32).reshape(H, 4, H)
    whh = jnp.pad(whh, ((0, Hp - H), (0, 0), (0, Hp - H)))
    whh = whh.reshape(Hp, 4 * Hp).astype(jnp.bfloat16)

    out_tm = pl.pallas_call(
        _lstm_chunk_kernel,
        out_shape=jax.ShapeDtypeStruct((S, B, Hp), jnp.float32),
        grid_spec=pltpu.PrefetchScalarGridSpec(
            num_scalar_prefetch=0,
            grid=(S // T,),
            in_specs=[
                # T timesteps of precomputed input gates per grid step.
                pl.BlockSpec((T, B, 4 * Hp), lambda s: (s, 0, 0)),
                # Constant index_map -> W_hh stays resident, no re-DMA per chunk.
                pl.BlockSpec((Hp, 4 * Hp), lambda s: (0, 0)),
            ],
            out_specs=pl.BlockSpec((T, B, Hp), lambda s: (s, 0, 0)),
            scratch_shapes=[
                pltpu.VMEM((B, Hp), jnp.float32),  # h state
                pltpu.VMEM((B, Hp), jnp.float32),  # c state
            ],
        ),
        compiler_params=pltpu.CompilerParams(
            dimension_semantics=("arbitrary",),  # recurrence: sequential over time
        ),
    )(gx, whh)

    # Drop gate padding, back to batch_first (B, S, H).
    return jnp.transpose(out_tm[:, :, :H], (1, 0, 2))


def lstm_reference(x, w_ih, w_hh, b_ih, b_hh):
    """Pure-JAX fp32 reference matching torch.nn.LSTM (num_layers=1, batch_first)."""
    B, S, D = x.shape
    H = w_hh.shape[1]

    def step(carry, x_t):
        h, c = carry
        gates = x_t @ w_ih.T + b_ih + h @ w_hh.T + b_hh
        i = jax.nn.sigmoid(gates[:, 0 * H:1 * H])
        f = jax.nn.sigmoid(gates[:, 1 * H:2 * H])
        g = jnp.tanh(gates[:, 2 * H:3 * H])
        o = jax.nn.sigmoid(gates[:, 3 * H:4 * H])
        c = f * c + i * g
        h = o * jnp.tanh(c)
        return (h, c), h

    h0 = jnp.zeros((B, H), jnp.float32)
    c0 = jnp.zeros((B, H), jnp.float32)
    _, hs = jax.lax.scan(step, (h0, c0), jnp.transpose(x, (1, 0, 2)))
    return jnp.transpose(hs, (1, 0, 2))


if __name__ == "__main__":
    d_model = 32   # D == H for this module
    batch, seq = 2, 8
    H = d_model

    key = jax.random.PRNGKey(0)
    kx, k1, k2, k3, k4 = jax.random.split(key, 5)

    # Deterministic parameter init (PyTorch-style uniform(-1/sqrt(H), 1/sqrt(H))).
    bound = 1.0 / jnp.sqrt(jnp.float32(H))
    w_ih = jax.random.uniform(k1, (4 * H, d_model), jnp.float32, -bound, bound)
    w_hh = jax.random.uniform(k2, (4 * H, H), jnp.float32, -bound, bound)
    b_ih = jax.random.uniform(k3, (4 * H,), jnp.float32, -bound, bound)
    b_hh = jax.random.uniform(k4, (4 * H,), jnp.float32, -bound, bound)

    x = jax.random.normal(kx, (batch, seq, d_model), jnp.float32)

    out = lstm_pallas(x, w_ih, w_hh, b_ih, b_hh, chunk_t=4)  # 2 chunks of 4 steps
    out = jax.block_until_ready(out)

    ref = lstm_reference(x, w_ih, w_hh, b_ih, b_hh)
    assert out.shape == (batch, seq, H)
    # W_hh goes through the MXU in bf16 (f32 accumulation & f32 h/c state), so
    # compare against the pure-f32 reference with a bf16-appropriate tolerance.
    assert jnp.allclose(out, ref, atol=2e-2, rtol=2e-2), "mismatch vs reference"

    print("KERNEL_OK")
</pallas_src>

<mosaic_0001>
module attributes {stable_mosaic.version = 11 : i64} {
  func.func @_lstm_chunk_kernel(%arg0: i32, %arg1: memref<4x2x512xf32, #tpu.memory_space<vmem>>, %arg2: memref<128x512xbf16, #tpu.memory_space<vmem>>, %arg3: memref<4x2x128xf32, #tpu.memory_space<vmem>>, %arg4: memref<2x128xf32, #tpu.memory_space<vmem>>, %arg5: memref<2x128xf32, #tpu.memory_space<vmem>>) attributes {dimension_semantics = [#tpu.dimension_semantics<arbitrary>], iteration_bounds = array<i64: 2>, scalar_prefetch = 0 : i64, scratch_operands = 2 : i64, tpu.core_type = #tpu.core_type<tc>, window_params = [{transform_indices = @transform_0, window_bounds = array<i64: 4, 2, 512>}, {pipeline_mode = #tpu.pipeline_mode<synchronous>, transform_indices = @transform_1, window_bounds = array<i64: 128, 512>}, {transform_indices = @transform_2, window_bounds = array<i64: 4, 2, 128>}]} {
    %c0_i32 = arith.constant 0 : i32
    %0 = arith.cmpi eq, %arg0, %c0_i32 : i32
    %1 = arith.extui %0 : i1 to i32
    %c0_i32_0 = arith.constant 0 : i32
    %2 = arith.cmpi ne, %1, %c0_i32_0 : i32
    scf.if %2 {
      %cst_46 = arith.constant 0.000000e+00 : f32
      %140 = vector.broadcast %cst_46 : f32 to vector<2x128xf32>
      %c0_47 = arith.constant 0 : index
      %c0_48 = arith.constant 0 : index
      %141 = vector.load %arg4[%c0_47, %c0_48] : memref<2x128xf32, #tpu.memory_space<vmem>>, vector<2x128xf32>
      tpu.vector_store %arg4[%c0_47, %c0_48], %140 {strides = array<i32>} : memref<2x128xf32, #tpu.memory_space<vmem>>, vector<2x128xf32>,
      %cst_49 = arith.constant 0.000000e+00 : f32
      %142 = vector.broadcast %cst_49 : f32 to vector<2x128xf32>
      %c0_50 = arith.constant 0 : index
      %c0_51 = arith.constant 0 : index
      %143 = vector.load %arg5[%c0_50, %c0_51] : memref<2x128xf32, #tpu.memory_space<vmem>>, vector<2x128xf32>
      tpu.vector_store %arg5[%c0_50, %c0_51], %142 {strides = array<i32>} : memref<2x128xf32, #tpu.memory_space<vmem>>, vector<2x128xf32>,
    } else {
    }
    %c0 = arith.constant 0 : index
    %c0_1 = arith.constant 0 : index
    %3 = vector.load %arg2[%c0, %c0_1] : memref<128x512xbf16, #tpu.memory_space<vmem>>, vector<128x512xbf16>
    %c0_2 = arith.constant 0 : index
    %c0_3 = arith.constant 0 : index
    %4 = vector.load %arg4[%c0_2, %c0_3] : memref<2x128xf32, #tpu.memory_space<vmem>>, vector<2x128xf32>
    %c0_4 = arith.constant 0 : index
    %c0_5 = arith.constant 0 : index
    %5 = vector.load %arg5[%c0_4, %c0_5] : memref<2x128xf32, #tpu.memory_space<vmem>>, vector<2x128xf32>
    %c0_6 = arith.constant 0 : index
    %c0_7 = arith.constant 0 : index
    %c0_8 = arith.constant 0 : index
    %6 = vector.load %arg1[%c0_6, %c0_7, %c0_8] : memref<4x2x512xf32, #tpu.memory_space<vmem>>, vector<1x2x512xf32>
    %7 = vector.shape_cast %6 : vector<1x2x512xf32> to vector<2x512xf32>
    %8 = arith.truncf %4 : vector<2x128xf32> to vector<2x128xbf16>
    %cst = arith.constant dense<0.000000e+00> : vector<2x512xf32>
    %9 = tpu.matmul %8, %3, %cst {dimension_numbers = #tpu.dot_dimension_numbers<[1], [0], [0], [1], [0, 0, 1, 1], [], []>} : vector<2x128xbf16>, vector<128x512xbf16>, vector<2x512xf32> -> vector<2x512xf32>
    %10 = arith.addf %7, %9 : vector<2x512xf32>
    %11 = vector.extract_strided_slice %10 {offsets = [0, 0], sizes = [2, 128], strides = [1, 1]} : vector<2x512xf32> to vector<2x128xf32>
    %12 = arith.negf %11 : vector<2x128xf32>
    %13 = math.exp %12 : vector<2x128xf32>
    %cst_9 = arith.constant 1.000000e+00 : f32
    %14 = vector.broadcast %cst_9 : f32 to vector<2x128xf32>
    %15 = arith.addf %14, %13 : vector<2x128xf32>
    %16 = arith.divf %14, %15 : vector<2x128xf32>
    %17 = vector.extract_strided_slice %10 {offsets = [0, 128], sizes = [2, 128], strides = [1, 1]} : vector<2x512xf32> to vector<2x128xf32>
    %18 = arith.negf %17 : vector<2x128xf32>
    %19 = math.exp %18 : vector<2x128xf32>
    %cst_10 = arith.constant 1.000000e+00 : f32
    %20 = vector.broadcast %cst_10 : f32 to vector<2x128xf32>
    %21 = arith.addf %20, %19 : vector<2x128xf32>
    %22 = arith.divf %20, %21 : vector<2x128xf32>
    %23 = vector.extract_strided_slice %10 {offsets = [0, 256], sizes = [2, 128], strides = [1, 1]} : vector<2x512xf32> to vector<2x128xf32>
    %24 = math.tanh %23 : vector<2x128xf32>
    %25 = vector.extract_strided_slice %10 {offsets = [0, 384], sizes = [2, 128], strides = [1, 1]} : vector<2x512xf32> to vector<2x128xf32>
    %26 = arith.negf %25 : vector<2x128xf32>
    %27 = math.exp %26 : vector<2x128xf32>
    %cst_11 = arith.constant 1.000000e+00 : f32
    %28 = vector.broadcast %cst_11 : f32 to vector<2x128xf32>
    %29 = arith.addf %28, %27 : vector<2x128xf32>
    %30 = arith.divf %28, %29 : vector<2x128xf32>
    %31 = arith.mulf %22, %5 : vector<2x128xf32>
    %32 = arith.mulf %16, %24 : vector<2x128xf32>
    %33 = arith.addf %31, %32 : vector<2x128xf32>
    %34 = math.tanh %33 : vector<2x128xf32>
    %35 = arith.mulf %30, %34 : vector<2x128xf32>
    %c0_12 = arith.constant 0 : index
    %c0_13 = arith.constant 0 : index
    %c0_14 = arith.constant 0 : index
    %36 = vector.load %arg3[%c0_12, %c0_13, %c0_14] : memref<4x2x128xf32, #tpu.memory_space<vmem>>, vector<1x2x128xf32>
    %37 = vector.shape_cast %36 : vector<1x2x128xf32> to vector<2x128xf32>
    %38 = vector.shape_cast %35 : vector<2x128xf32> to vector<1x2x128xf32>
    tpu.vector_store %arg3[%c0_12, %c0_13, %c0_14], %38 {strides = array<i32>} : memref<4x2x128xf32, #tpu.memory_space<vmem>>, vector<1x2x128xf32>,
    %c1 = arith.constant 1 : index
    %c0_15 = arith.constant 0 : index
    %c0_16 = arith.constant 0 : index
    %39 = vector.load %arg1[%c1, %c0_15, %c0_16] : memref<4x2x512xf32, #tpu.memory_space<vmem>>, vector<1x2x512xf32>
    %40 = vector.shape_cast %39 : vector<1x2x512xf32> to vector<2x512xf32>
    %41 = arith.truncf %35 : vector<2x128xf32> to vector<2x128xbf16>
    %cst_17 = arith.constant dense<0.000000e+00> : vector<2x512xf32>
    %42 = tpu.matmul %41, %3, %cst_17 {dimension_numbers = #tpu.dot_dimension_numbers<[1], [0], [0], [1], [0, 0, 1, 1], [], []>} : vector<2x128xbf16>, vector<128x512xbf16>, vector<2x512xf32> -> vector<2x512xf32>
    %43 = arith.addf %40, %42 : vector<2x512xf32>
    %44 = vector.extract_strided_slice %43 {offsets = [0, 0], sizes = [2, 128], strides = [1, 1]} : vector<2x512xf32> to vector<2x128xf32>
    %45 = arith.negf %44 : vector<2x128xf32>
    %46 = math.exp %45 : vector<2x128xf32>
    %cst_18 = arith.constant 1.000000e+00 : f32
    %47 = vector.broadcast %cst_18 : f32 to vector<2x128xf32>
    %48 = arith.addf %47, %46 : vector<2x128xf32>
    %49 = arith.divf %47, %48 : vector<2x128xf32>
    %50 = vector.extract_strided_slice %43 {offsets = [0, 128], sizes = [2, 128], strides = [1, 1]} : vector<2x512xf32> to vector<2x128xf32>
    %51 = arith.negf %50 : vector<2x128xf32>
    %52 = math.exp %51 : vector<2x128xf32>
    %cst_19 = arith.constant 1.000000e+00 : f32
    %53 = vector.broadcast %cst_19 : f32 to vector<2x128xf32>
    %54 = arith.addf %53, %52 : vector<2x128xf32>
    %55 = arith.divf %53, %54 : vector<2x128xf32>
    %56 = vector.extract_strided_slice %43 {offsets = [0, 256], sizes = [2, 128], strides = [1, 1]} : vector<2x512xf32> to vector<2x128xf32>
    %57 = math.tanh %56 : vector<2x128xf32>
    %58 = vector.extract_strided_slice %43 {offsets = [0, 384], sizes = [2, 128], strides = [1, 1]} : vector<2x512xf32> to vector<2x128xf32>
    %59 = arith.negf %58 : vector<2x128xf32>
    %60 = math.exp %59 : vector<2x128xf32>
    %cst_20 = arith.constant 1.000000e+00 : f32
    %61 = vector.broadcast %cst_20 : f32 to vector<2x128xf32>
    %62 = arith.addf %61, %60 : vector<2x128xf32>
    %63 = arith.divf %61, %62 : vector<2x128xf32>
    %64 = arith.mulf %55, %33 : vector<2x128xf32>
    %65 = arith.mulf %49, %57 : vector<2x128xf32>
    %66 = arith.addf %64, %65 : vector<2x128xf32>
    %67 = math.tanh %66 : vector<2x128xf32>
    %68 = arith.mulf %63, %67 : vector<2x128xf32>
    %c1_21 = arith.constant 1 : index
    %c0_22 = arith.constant 0 : index
    %c0_23 = arith.constant 0 : index
    %69 = vector.load %arg3[%c1_21, %c0_22, %c0_23] : memref<4x2x128xf32, #tpu.memory_space<vmem>>, vector<1x2x128xf32>
    %70 = vector.shape_cast %69 : vector<1x2x128xf32> to vector<2x128xf32>
    %71 = vector.shape_cast %68 : vector<2x128xf32> to vector<1x2x128xf32>
    tpu.vector_store %arg3[%c1_21, %c0_22, %c0_23], %71 {strides = array<i32>} : memref<4x2x128xf32, #tpu.memory_space<vmem>>, vector<1x2x128xf32>,
    %c2 = arith.constant 2 : index
    %c0_24 = arith.constant 0 : index
    %c0_25 = arith.constant 0 : index
    %72 = vector.load %arg1[%c2, %c0_24, %c0_25] : memref<4x2x512xf32, #tpu.memory_space<vmem>>, vector<1x2x512xf32>
    %73 = vector.shape_cast %72 : vector<1x2x512xf32> to vector<2x512xf32>
    %74 = arith.truncf %68 : vector<2x128xf32> to vector<2x128xbf16>
    %cst_26 = arith.constant dense<0.000000e+00> : vector<2x512xf32>
    %75 = tpu.matmul %74, %3, %cst_26 {dimension_numbers = #tpu.dot_dimension_numbers<[1], [0], [0], [1], [0, 0, 1, 1], [], []>} : vector<2x128xbf16>, vector<128x512xbf16>, vector<2x512xf32> -> vector<2x512xf32>
    %76 = arith.addf %73, %75 : vector<2x512xf32>
    %77 = vector.extract_strided_slice %76 {offsets = [0, 0], sizes = [2, 128], strides = [1, 1]} : vector<2x512xf32> to vector<2x128xf32>
    %78 = arith.negf %77 : vector<2x128xf32>
    %79 = math.exp %78 : vector<2x128xf32>
    %cst_27 = arith.constant 1.000000e+00 : f32
    %80 = vector.broadcast %cst_27 : f32 to vector<2x128xf32>
    %81 = arith.addf %80, %79 : vector<2x128xf32>
    %82 = arith.divf %80, %81 : vector<2x128xf32>
    %83 = vector.extract_strided_slice %76 {offsets = [0, 128], sizes = [2, 128], strides = [1, 1]} : vector<2x512xf32> to vector<2x128xf32>
    %84 = arith.negf %83 : vector<2x128xf32>
    %85 = math.exp %84 : vector<2x128xf32>
    %cst_28 = arith.constant 1.000000e+00 : f32
    %86 = vector.broadcast %cst_28 : f32 to vector<2x128xf32>
    %87 = arith.addf %86, %85 : vector<2x128xf32>
    %88 = arith.divf %86, %87 : vector<2x128xf32>
    %89 = vector.extract_strided_slice %76 {offsets = [0, 256], sizes = [2, 128], strides = [1, 1]} : vector<2x512xf32> to vector<2x128xf32>
    %90 = math.tanh %89 : vector<2x128xf32>
    %91 = vector.extract_strided_slice %76 {offsets = [0, 384], sizes = [2, 128], strides = [1, 1]} : vector<2x512xf32> to vector<2x128xf32>
    %92 = arith.negf %91 : vector<2x128xf32>
    %93 = math.exp %92 : vector<2x128xf32>
    %cst_29 = arith.constant 1.000000e+00 : f32
    %94 = vector.broadcast %cst_29 : f32 to vector<2x128xf32>
    %95 = arith.addf %94, %93 : vector<2x128xf32>
    %96 = arith.divf %94, %95 : vector<2x128xf32>
    %97 = arith.mulf %88, %66 : vector<2x128xf32>
    %98 = arith.mulf %82, %90 : vector<2x128xf32>
    %99 = arith.addf %97, %98 : vector<2x128xf32>
    %100 = math.tanh %99 : vector<2x128xf32>
    %101 = arith.mulf %96, %100 : vector<2x128xf32>
    %c2_30 = arith.constant 2 : index
    %c0_31 = arith.constant 0 : index
    %c0_32 = arith.constant 0 : index
    %102 = vector.load %arg3[%c2_30, %c0_31, %c0_32] : memref<4x2x128xf32, #tpu.memory_space<vmem>>, vector<1x2x128xf32>
    %103 = vector.shape_cast %102 : vector<1x2x128xf32> to vector<2x128xf32>
    %104 = vector.shape_cast %101 : vector<2x128xf32> to vector<1x2x128xf32>
    tpu.vector_store %arg3[%c2_30, %c0_31, %c0_32], %104 {strides = array<i32>} : memref<4x2x128xf32, #tpu.memory_space<vmem>>, vector<1x2x128xf32>,
    %c3 = arith.constant 3 : index
    %c0_33 = arith.constant 0 : index
    %c0_34 = arith.constant 0 : index
    %105 = vector.load %arg1[%c3, %c0_33, %c0_34] : memref<4x2x512xf32, #tpu.memory_space<vmem>>, vector<1x2x512xf32>
    %106 = vector.shape_cast %105 : vector<1x2x512xf32> to vector<2x512xf32>
    %107 = arith.truncf %101 : vector<2x128xf32> to vector<2x128xbf16>
    %cst_35 = arith.constant dense<0.000000e+00> : vector<2x512xf32>
    %108 = tpu.matmul %107, %3, %cst_35 {dimension_numbers = #tpu.dot_dimension_numbers<[1], [0], [0], [1], [0, 0, 1, 1], [], []>} : vector<2x128xbf16>, vector<128x512xbf16>, vector<2x512xf32> -> vector<2x512xf32>
    %109 = arith.addf %106, %108 : vector<2x512xf32>
    %110 = vector.extract_strided_slice %109 {offsets = [0, 0], sizes = [2, 128], strides = [1, 1]} : vector<2x512xf32> to vector<2x128xf32>
    %111 = arith.negf %110 : vector<2x128xf32>
    %112 = math.exp %111 : vector<2x128xf32>
    %cst_36 = arith.constant 1.000000e+00 : f32
    %113 = vector.broadcast %cst_36 : f32 to vector<2x128xf32>
    %114 = arith.addf %113, %112 : vector<2x128xf32>
    %115 = arith.divf %113, %114 : vector<2x128xf32>
    %116 = vector.extract_strided_slice %109 {offsets = [0, 128], sizes = [2, 128], strides = [1, 1]} : vector<2x512xf32> to vector<2x128xf32>
    %117 = arith.negf %116 : vector<2x128xf32>
    %118 = math.exp %117 : vector<2x128xf32>
    %cst_37 = arith.constant 1.000000e+00 : f32
    %119 = vector.broadcast %cst_37 : f32 to vector<2x128xf32>
    %120 = arith.addf %119, %118 : vector<2x128xf32>
    %121 = arith.divf %119, %120 : vector<2x128xf32>
    %122 = vector.extract_strided_slice %109 {offsets = [0, 256], sizes = [2, 128], strides = [1, 1]} : vector<2x512xf32> to vector<2x128xf32>
    %123 = math.tanh %122 : vector<2x128xf32>
    %124 = vector.extract_strided_slice %109 {offsets = [0, 384], sizes = [2, 128], strides = [1, 1]} : vector<2x512xf32> to vector<2x128xf32>
    %125 = arith.negf %124 : vector<2x128xf32>
    %126 = math.exp %125 : vector<2x128xf32>
    %cst_38 = arith.constant 1.000000e+00 : f32
    %127 = vector.broadcast %cst_38 : f32 to vector<2x128xf32>
    %128 = arith.addf %127, %126 : vector<2x128xf32>
    %129 = arith.divf %127, %128 : vector<2x128xf32>
    %130 = arith.mulf %121, %99 : vector<2x128xf32>
    %131 = arith.mulf %115, %123 : vector<2x128xf32>
    %132 = arith.addf %130, %131 : vector<2x128xf32>
    %133 = math.tanh %132 : vector<2x128xf32>
    %134 = arith.mulf %129, %133 : vector<2x128xf32>
    %c3_39 = arith.constant 3 : index
    %c0_40 = arith.constant 0 : index
    %c0_41 = arith.constant 0 : index
    %135 = vector.load %arg3[%c3_39, %c0_40, %c0_41] : memref<4x2x128xf32, #tpu.memory_space<vmem>>, vector<1x2x128xf32>
    %136 = vector.shape_cast %135 : vector<1x2x128xf32> to vector<2x128xf32>
    %137 = vector.shape_cast %134 : vector<2x128xf32> to vector<1x2x128xf32>
    tpu.vector_store %arg3[%c3_39, %c0_40, %c0_41], %137 {strides = array<i32>} : memref<4x2x128xf32, #tpu.memory_space<vmem>>, vector<1x2x128xf32>,
    %c0_42 = arith.constant 0 : index
    %c0_43 = arith.constant 0 : index
    %138 = vector.load %arg4[%c0_42, %c0_43] : memref<2x128xf32, #tpu.memory_space<vmem>>, vector<2x128xf32>
    tpu.vector_store %arg4[%c0_42, %c0_43], %134 {strides = array<i32>} : memref<2x128xf32, #tpu.memory_space<vmem>>, vector<2x128xf32>,
    %c0_44 = arith.constant 0 : index
    %c0_45 = arith.constant 0 : index
    %139 = vector.load %arg5[%c0_44, %c0_45] : memref<2x128xf32, #tpu.memory_space<vmem>>, vector<2x128xf32>
    tpu.vector_store %arg5[%c0_44, %c0_45], %132 {strides = array<i32>} : memref<2x128xf32, #tpu.memory_space<vmem>>, vector<2x128xf32>,
    return
  }
  func.func @transform_0(%arg0: i32) -> (i32, i32, i32) {
    %c0_i32 = arith.constant 0 : i32
    %c0_i32_0 = arith.constant 0 : i32
    %c0_i32_1 = arith.constant 0 : i32
    return %arg0, %c0_i32, %c0_i32_0 : i32, i32, i32
  }
  func.func @transform_1(%arg0: i32) -> (i32, i32) {
    %c0_i32 = arith.constant 0 : i32
    %c0_i32_0 = arith.constant 0 : i32
    %c0_i32_1 = arith.constant 0 : i32
    return %c0_i32, %c0_i32_0 : i32, i32
  }
  func.func @transform_2(%arg0: i32) -> (i32, i32, i32) {
    %c0_i32 = arith.constant 0 : i32
    %c0_i32_0 = arith.constant 0 : i32
    %c0_i32_1 = arith.constant 0 : i32
    return %arg0, %c0_i32, %c0_i32_0 : i32, i32, i32
  }
}

</mosaic_0001>

<bundles_post_ra>
// kernel: tpu_custom_call.1
= control target key start
LH: loop header
LB: loop body
LE: loop exit
PB: predicated region body
PF: predicated region fallthrough
CT: control target
= control target key end

     0   :  { %7 = vsyncpa [#allocation5], 0  ;;  %s1897_s0 = inlined_call_operand.hbm [shape: f32[8,2,512], index: 0, kind: input, shape index: {}]   ;;  %s1898_s1 = inlined_call_operand.hbm [shape: bf16[128,512], index: 1, kind: input, shape index: {}]   ;;  %s1899_s2 = inlined_call_operand.hbm [shape: f32[8,2,128], index: 2, kind: output, shape index: {}]  }
   0x1   :  { %9 = vsyncpa [#allocation5 + $0x1], 0 }
   0x2   :  { %10 = vsyncpa [#allocation8], 0 }
   0x3   :  { %11 = vsyncpa [#allocation6], 0 }
   0x4   :  { %13 = vsyncpa [#allocation6 + $0x1], 0  ;;  %s1524_s9 = smov 0   ;;  %s1526_s10 = smov 0  }
   0x5   :  { %s1528_s11 = smov 0   ;;  %s1530_s12 = smov 0  }
   0x6 LB: > { %s1545_s13 = sadd.s32 4294967295, %s1499_s12   ;;  %s1042_s14 = sadd.s32 4294967294, %s1499_s12   ;;  %s1499_s12 = sphi %s1530_s12, %s1910_s12   ;;  %s1495_s11 = sphi %s1528_s11, %s1909_s11   ;;  %s1491_s10 = sphi %s1526_s10, %s1908_s10   ;;  %s1487_s9 = sphi %s1524_s9, %s1907_s9  }
   0x7   : > { %p39_p0 = scmp.ne.s32.totalorder %s1491_s10, %s1487_s9  ;;  %p40_p1 = scmp.eq.s32.totalorder %s1545_s13, 0 }
   0x8   : > { %p84_p2 = scmp.eq.s32.totalorder %s1545_s13, 1  ;;  %p90_p3 = scmp.eq.s32.totalorder %s1042_s14, 1 }
   0x9   : > { %p1554_p4 = por %p40_p1, %p39_p0  ;;  %p1043_p5 = scmp.ge.s32.totalorder %s1499_s12, 1 }
   0xa   : > { %p1559_p6 = por %p90_p3, %p39_p0  ;;  %p97_p7 = scmp.lt.s32.totalorder %s1499_s12, 3 }
   0xb   : > { %s108_s19 = sshll.u32 %s1898_s1, 4  ;;  %s1501_s21 = smov [#allocation7]   ;;  %s109_s19 = int_to_ptr.hbm [resolvable:$true] %s108_s19 }
   0xc   : > { %p1568_p9 = pnand %p1043_p5, %p97_p7  ;;  %s110_s22 = sshll.u32 %s1501_s21, 4  ;;  %s111_s22 = int_to_ptr.vmem [resolvable:$true] %s110_s22 }
   0xd   : > { %s1578_s23 = sadd.s32 1, %s1499_s12   ;;  %s1502_s24 = smov 256  }
   0xe   : > { %p1249_p10 = pneg %p1568_p9  ;;  %s1503_s25 = smov 16  }
   0xf   : > { %s23_s26 = ssub.s32 %s1499_s12, %s1578_s23  ;;  %s26_s27 = sadd.s32 1, %s1495_s11 }
  0x10   : > { %p1250_p11 = pnand %p1249_p10, %p40_p1  ;;  %p24_p13 = scmp.eq.s32.totalorder %s23_s26, 0 }
  0x11   : > { %p33_p0 = scmp.ne.s32.totalorder %s1495_s11, %s1491_s10  ;;  %p34_p3 = scmp.eq.s32.totalorder %s1499_s12, 0 }
  0x12   : > { %1252 = dma.hbm_to_vmem [thread:$0]  (!%p1250_p11), %s109_s19, 4096, %s111_s22, [#allocation8], %s1502_s24, %s1502_s24, %s1503_s25  }
  0x13   : > { %p1262_p5 = scmp.lt.s32.totalorder %s1499_s12, 2  ;;  %p35_p7 = por %p34_p3, %p33_p0 }
  0x14   : > { %s1588_s28 = scalar_select %p24_p13, %s1495_s11, %s26_s27  }
  0x15   : > { %p1592_p10 = por %p84_p2, %p33_p0  ;;  %s124_s30 = sand.u32 1, %s1495_s11  }
  0x16   : > { %s1207_s3 = sshll.u32 %s1499_s12, 5  ;;  %s1046_s4 = sshll.u32 %s124_s30, 5 }
  0x17   : > { %s134_s7 = scalar_lea.hbm %s1897_s0, %s1207_s3  ;;  %s128_s14 = scalar_lea.vmem [#allocation4], %s1046_s4 }
  0x18   : > { %s135_s8 = sshll.u32 %s134_s7, 4  ;;  %s137_s17 = sshll.u32 %s128_s14, 4  ;;  %s136_s8 = int_to_ptr.hbm [resolvable:$true] %s135_s8  ;;  %s138_s17 = int_to_ptr.vmem [resolvable:$true] %s137_s17 }
  0x19   : > { %p1603_p11 = pnand %p1262_p5, %p35_p7  ;;  %s125_s19 = scalar_lea.sflag [#allocation5], %s124_s30 }
  0x1a   : > { %s1399_s21 = sshra.s32 %s136_s8, 4  ;;  %s1406_s26 = scalar_lea.hbm %s1897_s0, 64  ;;  %s1400_s21 = int_to_ptr.hbm [resolvable:$true] %s1399_s21 }
  0x1b   : > { %s1401_s22 = scalar_lea.hbm %s1400_s21, 32  ;;  %p1403_p13 = pneg %p1603_p11 }
  0x1c   : > { %p1402_p2 = scmp.ne.s32.totalorder %s1400_s21, %s1401_s22  ;;  %p1407_p5 = scmp.lt.s32.totalorder %s1400_s21, %s1897_s0 }
  0x1d   : > { %p1408_p7 = scmp.lt.s32.totalorder %s1406_s26, %s1401_s22 }
  0x1e   : > { %p1404_p0 = pnand %p1403_p13, %p1402_p2 }
  0x1f   : > { %p1409_p12 = por %p1408_p7, %p1407_p5 }
  0x20   : > { %p1405_p3 = pneg %p1404_p0 }
  0x22   : > { %p1410_p8 = pnand %p1409_p12, %p1405_p3 }
  0x24   : > { %1413 = shalt.err (!%p1410_p8)
}
  0x25   : > { %s1504_s30 = smov 128   ;;  %s1505_s4 = smov 8  }
  0x26   : > { %1256 = dma.hbm_to_vmem [thread:$0]  (!%p1603_p11), %s136_s8, 512, %s138_s17, %s125_s19, %s1504_s30, %s1504_s30, %s1505_s4  }
  0x27   : > { %149 = sbr.rel (%p1568_p9) target bundleno = 832 (0x340), region = 28  ;;  %s1620_s5 = sand.u32 (!%p1568_p9), 1, %s1491_s10  }
  0x28   : > { %s1051_s6 = sshll.u32 (!%p1568_p9), %s1620_s5, 5  ;;  %s152_s7 = scalar_lea.sflag (!%p1568_p9), [#allocation5], %s1620_s5 }
  0x29   : > { %s1624_s14 = scalar_lea.vmem (!%p1568_p9), [#allocation4], %s1051_s6 }
  0x2c   : > { %1474 = dma.done.wait (%p1554_p4), %s152_s7, 512  }
  0x2d   : > { %1476 = vsyncadd (%p1554_p4), %s152_s7, 4294966784 }
  0x2e   : > { %1478 = dma.done.wait (%p40_p1), [#allocation8], 4096  }
  0x2f   : > { %1480 = vsyncadd (%p40_p1), [#allocation8], 4294963200  ;;  %s1053_s20 = sshll.u32 %s1620_s5, 3  ;;  %p1905_p8 = scmp.ne.s32.totalorder %s1545_s13, 0 }
  0x30   : > { %s1635_s8 = scalar_lea.vmem [#allocation9], %s1053_s20 }
  0x31   : > { %187 = sbr.rel (%p1905_p8) target bundleno = 57 (0x39), region = 40 }
  0x36   : > { %v1506_v0 = vmov 0.0  }
  0x37   : > { %188 = vst [vmem:[#allocation2] sm:$0x3] %v1506_v0 }
  0x38   : > { %189 = vst [vmem:[#allocation3] sm:$0x3] %v1506_v0 }
  0x39 PF: > { %v1169_v1 = vld [vmem:[#allocation7 + $0xe0] sm:$0xf]  ;;  %v1238_v2 = vld [vmem:[#allocation7 + $0xec] sm:$0xf0]  ;;  %v1236_v3 = vld [vmem:[#allocation7 + $0xe4] sm:$0xf] }
  0x3a   : > { %v1639_v4 = vor.u32 %v1238_v2, %v1169_v1  ;;  %v1171_v5 = vld [vmem:[#allocation7 + $0xf0] sm:$0xf0]  ;;  %v1177_v6 = vld [vmem:[#allocation7 + $0xe8] sm:$0xf]  ;;  %v1239_v7 = vld [vmem:[#allocation7 + $0xf4] sm:$0xf0] }
  0x3b   : > { %v1641_v8 = vor.u32 %v1236_v3, %v1171_v5  ;;  %v1643_v9 = vor.u32 %v1239_v7, %v1177_v6  ;;  %v1237_v10 = vld [vmem:[#allocation7 + $0xec] sm:$0xf]  ;;  %v1179_v11 = vld [vmem:[#allocation7 + $0xf8] sm:$0xf0]  ;;  %v1153_v12 = vld [vmem:[#allocation7 + $0xc0] sm:$0xf] }
  0x3c   : > { %386 = vmatpush.bf16.msra.mxu0 %v1639_v4  ;;  %v1646_v13 = vor.u32 %v1237_v10, %v1179_v11  ;;  %v1234_v14 = vld [vmem:[#allocation7 + $0xcc] sm:$0xf0]  ;;  %v1232_v15 = vld [vmem:[#allocation7 + $0xc4] sm:$0xf]  ;;  %v1155_v16 = vld [vmem:[#allocation7 + $0xd0] sm:$0xf0] }
  0x3d   : > { %399 = vmatpush.bf16.msra.mxu1 %v1641_v8  ;;  %412 = vmatpush.bf16.msra.mxu2 %v1643_v9  ;;  %v1650_v17 = vor.u32 %v1234_v14, %v1153_v12  ;;  %v1652_v18 = vor.u32 %v1232_v15, %v1155_v16  ;;  %v1161_v19 = vld [vmem:[#allocation7 + $0xc8] sm:$0xf]  ;;  %v1235_v20 = vld [vmem:[#allocation7 + $0xd4] sm:$0xf0]  ;;  %v1233_v21 = vld [vmem:[#allocation7 + $0xcc] sm:$0xf] }
  0x3e   : > { %425 = vmatpush.bf16.msra.mxu3 %v1646_v13  ;;  %v1655_v22 = vor.u32 %v1235_v20, %v1161_v19  ;;  %v1163_v23 = vld [vmem:[#allocation7 + $0xd8] sm:$0xf0]  ;;  %v1137_v24 = vld [vmem:[#allocation7 + $0xa0] sm:$0xf]  ;;  %v1230_v25 = vld [vmem:[#allocation7 + $0xac] sm:$0xf0] }
  0x3f   : > { %v1657_v26 = vor.u32 %v1233_v21, %v1163_v23  ;;  %v1228_v27 = vld [vmem:[#allocation7 + $0xa4] sm:$0xf]  ;;  %v1139_v28 = vld [vmem:[#allocation7 + $0xb0] sm:$0xf0]  ;;  %v1145_v29 = vld [vmem:[#allocation7 + $0xa8] sm:$0xf]  ;;  %v1660_v30 = vor.u32 %v1230_v25, %v1137_v24 }
  0x40   : > { %387 = vmatpush.bf16.msra.mxu0 %v1650_v17  ;;  %v1231_v31 = vld [vmem:[#allocation7 + $0xb4] sm:$0xf0]  ;;  %v1229_v32 = vld [vmem:[#allocation7 + $0xac] sm:$0xf]  ;;  %v1147_v33 = vld [vmem:[#allocation7 + $0xb8] sm:$0xf0]  ;;  %v1664_v34 = vor.u32 %v1228_v27, %v1139_v28 }
  0x41   : > { %400 = vmatpush.bf16.msra.mxu1 %v1652_v18  ;;  %413 = vmatpush.bf16.msra.mxu2 %v1655_v22  ;;  %v1666_v35 = vor.u32 %v1231_v31, %v1145_v29  ;;  %v1121_v36 = vld [vmem:[#allocation7 + $0x80] sm:$0xf]  ;;  %v1226_v37 = vld [vmem:[#allocation7 + $0x8c] sm:$0xf0]  ;;  %v1224_v38 = vld [vmem:[#allocation7 + $0x84] sm:$0xf]  ;;  %v1669_v39 = vor.u32 %v1229_v32, %v1147_v33 }
  0x42   : > { %426 = vmatpush.bf16.msra.mxu3 %v1657_v26  ;;  %v1123_v40 = vld [vmem:[#allocation7 + $0x90] sm:$0xf0]  ;;  %v1129_v41 = vld [vmem:[#allocation7 + $0x88] sm:$0xf]  ;;  %v1227_v42 = vld [vmem:[#allocation7 + $0x94] sm:$0xf0]  ;;  %v1672_v45 = vor.u32 %v1226_v37, %v1121_v36 }
  0x43   : > { %v1225_v43 = vld [vmem:[#allocation7 + $0x8c] sm:$0xf]  ;;  %v1131_v44 = vld [vmem:[#allocation7 + $0x98] sm:$0xf0]  ;;  %v1676_v46 = vor.u32 %v1224_v38, %v1123_v40  ;;  %v1678_v47 = vor.u32 %v1227_v42, %v1129_v41  ;;  %v1105_v48 = vld [vmem:[#allocation7 + $0x60] sm:$0xf] }
  0x44   : > { %388 = vmatpush.bf16.msra.mxu0 %v1660_v30  ;;  %v1222_v49 = vld [vmem:[#allocation7 + $0x6c] sm:$0xf0]  ;;  %v1220_v50 = vld [vmem:[#allocation7 + $0x64] sm:$0xf]  ;;  %v1681_v51 = vor.u32 %v1225_v43, %v1131_v44  ;;  %v1107_v52 = vld [vmem:[#allocation7 + $0x70] sm:$0xf0] }
  0x45   : > { %401 = vmatpush.bf16.msra.mxu1 %v1664_v34  ;;  %414 = vmatpush.bf16.msra.mxu2 %v1666_v35  ;;  %v1113_v53 = vld [vmem:[#allocation7 + $0x68] sm:$0xf]  ;;  %v1223_v54 = vld [vmem:[#allocation7 + $0x74] sm:$0xf0]  ;;  %v1221_v55 = vld [vmem:[#allocation7 + $0x6c] sm:$0xf]  ;;  %v1684_v57 = vor.u32 %v1222_v49, %v1105_v48  ;;  %v1688_v58 = vor.u32 %v1220_v50, %v1107_v52 }
  0x46   : > { %427 = vmatpush.bf16.msra.mxu3 %v1669_v39  ;;  %v1115_v56 = vld [vmem:[#allocation7 + $0x78] sm:$0xf0]  ;;  %v1690_v59 = vor.u32 %v1223_v54, %v1113_v53  ;;  %v1089_v60 = vld [vmem:[#allocation7 + $0x40] sm:$0xf]  ;;  %v1218_v61 = vld [vmem:[#allocation7 + $0x4c] sm:$0xf0] }
  0x47   : > { %v1216_v62 = vld [vmem:[#allocation7 + $0x44] sm:$0xf]  ;;  %v1693_v63 = vor.u32 %v1221_v55, %v1115_v56  ;;  %v1091_v0 = vld [vmem:[#allocation7 + $0x50] sm:$0xf0]  ;;  %v1097_v1 = vld [vmem:[#allocation7 + $0x48] sm:$0xf]  ;;  %v1696_v6 = vor.u32 %v1218_v61, %v1089_v60 }
  0x48   : > { %389 = vmatpush.bf16.msra.mxu0 %v1672_v45  ;;  %v1219_v2 = vld [vmem:[#allocation7 + $0x54] sm:$0xf0]  ;;  %v1217_v3 = vld [vmem:[#allocation7 + $0x4c] sm:$0xf]  ;;  %v1099_v5 = vld [vmem:[#allocation7 + $0x58] sm:$0xf0]  ;;  %v1700_v7 = vor.u32 %v1216_v62, %v1091_v0 }
  0x49   : > { %402 = vmatpush.bf16.msra.mxu1 %v1676_v46  ;;  %415 = vmatpush.bf16.msra.mxu2 %v1678_v47  ;;  %v1702_v10 = vor.u32 %v1219_v2, %v1097_v1  ;;  %v1073_v11 = vld [vmem:[#allocation7 + $0x20] sm:$0xf]  ;;  %v1214_v12 = vld [vmem:[#allocation7 + $0x2c] sm:$0xf0]  ;;  %v1212_v14 = vld [vmem:[#allocation7 + $0x24] sm:$0xf]  ;;  %v1705_v15 = vor.u32 %v1217_v3, %v1099_v5 }
  0x4a   : > { %428 = vmatpush.bf16.msra.mxu3 %v1681_v51  ;;  %v1075_v16 = vld [vmem:[#allocation7 + $0x30] sm:$0xf0]  ;;  %v1081_v19 = vld [vmem:[#allocation7 + $0x28] sm:$0xf]  ;;  %v1215_v20 = vld [vmem:[#allocation7 + $0x34] sm:$0xf0]  ;;  %v1708_v24 = vor.u32 %v1214_v12, %v1073_v11 }
  0x4b   : > { %v1213_v21 = vld [vmem:[#allocation7 + $0x2c] sm:$0xf]  ;;  %v1083_v23 = vld [vmem:[#allocation7 + $0x38] sm:$0xf0]  ;;  %v1712_v25 = vor.u32 %v1212_v14, %v1075_v16  ;;  %v1714_v27 = vor.u32 %v1215_v20, %v1081_v19  ;;  %v1057_v28 = vld [vmem:[#allocation7] sm:$0xf] }
  0x4c   : > { %390 = vmatpush.bf16.msra.mxu0 %v1684_v57  ;;  %v1210_v29 = vld [vmem:[#allocation7 + $0xc] sm:$0xf0]  ;;  %v1208_v31 = vld [vmem:[#allocation7 + $0x4] sm:$0xf]  ;;  %v1717_v32 = vor.u32 %v1213_v21, %v1083_v23  ;;  %v1059_v33 = vld [vmem:[#allocation7 + $0x10] sm:$0xf0] }
  0x4d   : > { %403 = vmatpush.bf16.msra.mxu1 %v1688_v58  ;;  %416 = vmatpush.bf16.msra.mxu2 %v1690_v59  ;;  %v1065_v36 = vld [vmem:[#allocation7 + $0x8] sm:$0xf]  ;;  %v1211_v37 = vld [vmem:[#allocation7 + $0x14] sm:$0xf0]  ;;  %v1209_v38 = vld [vmem:[#allocation7 + $0xc] sm:$0xf]  ;;  %v1720_v41 = vor.u32 %v1210_v29, %v1057_v28  ;;  %v1724_v43 = vor.u32 %v1208_v31, %v1059_v33 }
  0x4e   : > { %429 = vmatpush.bf16.msra.mxu3 %v1693_v63  ;;  %v1067_v40 = vld [vmem:[#allocation7 + $0x18] sm:$0xf0]  ;;  %v1726_v44 = vor.u32 %v1211_v37, %v1065_v36  ;;  %vm445_vm0 = vcmask 1041408   ;;  %vm447_vm1 = vcmask 1045508   ;;  %vm449_vm2 = vcmask 1043456   ;;  %v224_v1 = vld [vmem:[%s1624_s14] sm:$0xff] }
  0x4f   : > { %v222_v42 = vld [vmem:[#allocation2] sm:$0x3]  ;;  %v1729_v48 = vor.u32 %v1209_v38, %v1067_v40  ;;  %s1240_s15 = sshll.u32 %s1545_s13, 3  ;;  %s956_s21 = sshll.u32 %s1635_s8, 4  ;;  %s957_s21 = int_to_ptr.vmem [resolvable:$true] %s956_s21 }
  0x50   : > { %391 = vmatpush.bf16.msra.mxu0 %v1696_v6  ;;  %v225_v49 = vpack.c.bf16 %v222_v42, %v222_v42  ;;  %s955_s19 = scalar_lea.hbm %s1899_s2, %s1240_s15  ;;  %s944_s13 = scalar_lea.sflag [#allocation6], %s1620_s5 }
  0x51   : > { %404 = vmatpush.bf16.msra.mxu1 %v1700_v7  ;;  %417 = vmatpush.bf16.msra.mxu2 %v1702_v10  ;;  %s958_s22 = sshll.u32 %s955_s19, 4  ;;  %s1449_s3 = scalar_lea.hbm %s1899_s2, 16  ;;  %s959_s22 = int_to_ptr.hbm [resolvable:$true] %s958_s22 }
  0x52   : > { %430 = vmatpush.bf16.msra.mxu3 %v1705_v15  ;;  %s1443_s24 = sshra.s32 %s959_s22, 4  ;;  %s1444_s24 = int_to_ptr.hbm [resolvable:$true] %s1443_s24 }
  0x53   : > { %s1445_s25 = scalar_lea.hbm %s1444_s24, 8  ;;  %p1450_p12 = scmp.lt.s32.totalorder %s1444_s24, %s1899_s2 }
  0x54   : > { %392 = vmatpush.bf16.msra.mxu0 %v1708_v24  ;;  %p1446_p1 = scmp.ne.s32.totalorder %s1444_s24, %s1445_s25  ;;  %p1451_p11 = scmp.lt.s32.totalorder %s1449_s3, %s1445_s25 }
  0x55   : > { %405 = vmatpush.bf16.msra.mxu1 %v1712_v25  ;;  %418 = vmatpush.bf16.msra.mxu2 %v1714_v27 }
  0x56   : > { %431 = vmatpush.bf16.msra.mxu3 %v1717_v32  ;;  %p1447_p4 = pnand %p1446_p1, %p1592_p10  ;;  %p1452_p2 = por %p1451_p11, %p1450_p12 }
  0x58   : > { %393 = vmatpush.bf16.msra.mxu0 %v1720_v41  ;;  %p1448_p9 = pneg %p1447_p4 }
  0x59   : > { %406 = vmatpush.bf16.msra.mxu1 %v1724_v43  ;;  %419 = vmatpush.bf16.msra.mxu2 %v1726_v44 }
  0x5a   : > { %432 = vmatpush.bf16.msra.mxu3 %v1729_v48  ;;  %p1453_p13 = pnand %p1452_p2, %p1448_p9 }
  0x5b   : > { %394 = vmatmul.bf16.vlgmr.msra.gmra.mxu0 %v225_v49 }
  0x5c   : > { %527 = vmatpush.bf16.msrb.mxu0 %v1639_v4  ;;  %407 = vmatmul.bf16.vlgmr.msra.gmra.mxu1 %v225_v49 }
  0x5d   : > { %540 = vmatpush.bf16.msrb.mxu1 %v1641_v8  ;;  %420 = vmatmul.bf16.vlgmr.msra.gmra.mxu2 %v225_v49 }
  0x5e   : > { %433 = vmatmul.bf16.vlgmr.msra.gmra.mxu3 %v225_v49  ;;  %553 = vmatpush.bf16.msrb.mxu2 %v1643_v9 }
  0x5f   : > { %566 = vmatpush.bf16.msrb.mxu3 %v1646_v13 }
  0x60   : > { %528 = vmatpush.bf16.msrb.mxu0 %v1650_v17 }
  0x61   : > { %541 = vmatpush.bf16.msrb.mxu1 %v1652_v18 }
  0x62   : > { %554 = vmatpush.bf16.msrb.mxu2 %v1655_v22 }
  0x63   : > { %567 = vmatpush.bf16.msrb.mxu3 %v1657_v26 }
  0x64   : > { %529 = vmatpush.bf16.msrb.mxu0 %v1660_v30 }
  0x65   : > { %542 = vmatpush.bf16.msrb.mxu1 %v1664_v34 }
  0x66   : > { %555 = vmatpush.bf16.msrb.mxu2 %v1666_v35 }
  0x67   : > { %568 = vmatpush.bf16.msrb.mxu3 %v1669_v39 }
  0x68   : > { %530 = vmatpush.bf16.msrb.mxu0 %v1672_v45 }
  0x69   : > { %543 = vmatpush.bf16.msrb.mxu1 %v1676_v46 }
  0x6a   : > { %556 = vmatpush.bf16.msrb.mxu2 %v1678_v47 }
  0x6b   : > { %569 = vmatpush.bf16.msrb.mxu3 %v1681_v51 }
  0x6c   : > { %531 = vmatpush.bf16.msrb.mxu0 %v1684_v57 }
  0x6d   : > { %544 = vmatpush.bf16.msrb.mxu1 %v1688_v58 }
  0x6e   : > { %557 = vmatpush.bf16.msrb.mxu2 %v1690_v59 }
  0x6f   : > { %570 = vmatpush.bf16.msrb.mxu3 %v1693_v63 }
  0x70   : > { %532 = vmatpush.bf16.msrb.mxu0 %v1696_v6 }
  0x71   : > { %545 = vmatpush.bf16.msrb.mxu1 %v1700_v7 }
  0x72   : > { %558 = vmatpush.bf16.msrb.mxu2 %v1702_v10 }
  0x73   : > { %571 = vmatpush.bf16.msrb.mxu3 %v1705_v15 }
  0x74   : > { %533 = vmatpush.bf16.msrb.mxu0 %v1708_v24 }
  0x75   : > { %546 = vmatpush.bf16.msrb.mxu1 %v1712_v25 }
  0x76   : > { %559 = vmatpush.bf16.msrb.mxu2 %v1714_v27 }
  0x77   : > { %572 = vmatpush.bf16.msrb.mxu3 %v1717_v32 }
  0x78   : > { %534 = vmatpush.bf16.msrb.mxu0 %v1720_v41 }
  0x79   : > { %547 = vmatpush.bf16.msrb.mxu1 %v1724_v43 }
  0x7a   : > { %560 = vmatpush.bf16.msrb.mxu2 %v1726_v44 }
  0x7b   : > { %573 = vmatpush.bf16.msrb.mxu3 %v1729_v48 }
  0x7c   : > { %666 = vmatpush.bf16.msra.mxu0 %v1639_v4 }
  0x7d   : > { %679 = vmatpush.bf16.msra.mxu1 %v1641_v8 }
  0x7e   : > { %692 = vmatpush.bf16.msra.mxu2 %v1643_v9 }
  0x7f   : > { %705 = vmatpush.bf16.msra.mxu3 %v1646_v13 }
  0x80   : > { %667 = vmatpush.bf16.msra.mxu0 %v1650_v17 }
  0x81   : > { %680 = vmatpush.bf16.msra.mxu1 %v1652_v18 }
  0x82   : > { %693 = vmatpush.bf16.msra.mxu2 %v1655_v22 }
  0x83   : > { %706 = vmatpush.bf16.msra.mxu3 %v1657_v26 }
  0x84   : > { %668 = vmatpush.bf16.msra.mxu0 %v1660_v30 }
  0x85   : > { %681 = vmatpush.bf16.msra.mxu1 %v1664_v34 }
  0x86   : > { %694 = vmatpush.bf16.msra.mxu2 %v1666_v35 }
  0x87   : > { %707 = vmatpush.bf16.msra.mxu3 %v1669_v39 }
  0x88   : > { %669 = vmatpush.bf16.msra.mxu0 %v1672_v45 }
  0x89   : > { %682 = vmatpush.bf16.msra.mxu1 %v1676_v46 }
  0x8a   : > { %695 = vmatpush.bf16.msra.mxu2 %v1678_v47 }
  0x8b   : > { %708 = vmatpush.bf16.msra.mxu3 %v1681_v51 }
  0x8c   : > { %670 = vmatpush.bf16.msra.mxu0 %v1684_v57 }
  0x8d   : > { %683 = vmatpush.bf16.msra.mxu1 %v1688_v58 }
  0x8e   : > { %696 = vmatpush.bf16.msra.mxu2 %v1690_v59 }
  0x8f   : > { %709 = vmatpush.bf16.msra.mxu3 %v1693_v63 }
  0x90   : > { %671 = vmatpush.bf16.msra.mxu0 %v1696_v6 }
  0x91   : > { %684 = vmatpush.bf16.msra.mxu1 %v1700_v7 }
  0x92   : > { %697 = vmatpush.bf16.msra.mxu2 %v1702_v10 }
  0x93   : > { %710 = vmatpush.bf16.msra.mxu3 %v1705_v15 }
  0x94   : > { %672 = vmatpush.bf16.msra.mxu0 %v1708_v24 }
  0x95   : > { %685 = vmatpush.bf16.msra.mxu1 %v1712_v25 }
  0x96   : > { %698 = vmatpush.bf16.msra.mxu2 %v1714_v27 }
  0x97   : > { %711 = vmatpush.bf16.msra.mxu3 %v1717_v32 }
  0x98   : > { %673 = vmatpush.bf16.msra.mxu0 %v1720_v41 }
  0x99   : > { %686 = vmatpush.bf16.msra.mxu1 %v1724_v43 }
  0x9a   : > { %699 = vmatpush.bf16.msra.mxu2 %v1726_v44 }
  0x9b   : > { %712 = vmatpush.bf16.msra.mxu3 %v1729_v48 }
  0xd8   : > { %v395_v50 = vpop.f32.mrf.mxu0 }
  0xd9   : > { %v408_v52 = vpop.f32.mrf.mxu1 }
  0xda   : > { %v442_v53 = vrot.slane %v408_v52, 6 }
  0xdc   : > { %v446_v61 = vsel %vm445_vm0, %v395_v50, %v442_v53 }
  0xe0   : > { %v421_v54 = vpop.f32.mrf.mxu2  ;;  %v397_v60 = vpop.f32.mrf.mxu0 }
  0xe1   : > { %v443_v55 = vrot.slane %v421_v54, 4  ;;  %v434_v56 = vpop.f32.mrf.mxu3  ;;  %v410_v0 = vpop.f32.mrf.mxu1 }
  0xe2   : > { %v444_v62 = vrot.slane %v434_v56, 2 }
  0xe4   : > { %v448_v2 = vsel %vm447_vm1, %v443_v55, %v444_v62 }
  0xe5   : > { %v450_v3 = vsel %vm449_vm2, %v446_v61, %v448_v2 }
  0xe6   : > { %v452_v5 = vadd.f32 %v450_v3, %v224_v1 }
  0xe8   : > { %v1183_v11 = vmul.f32 -1.442695, %v452_v5  ;;  %v473_v12 = vrot.slane %v452_v5, 2  ;;  %v497_v14 = vrot.slane %v452_v5, 6  ;;  %v423_v16 = vpop.f32.mrf.mxu2  ;;  %v494_v42 = vrot.slane %v452_v5, 4 }
  0xe9   : > { %v436_v19 = vpop.f32.mrf.mxu3 }
  0xea   : > { %1305 = vpow2.f32 %v1183_v11  ;;  %v1184_v20 = vmul.f32 -1.442695, %v473_v12  ;;  %v1185_v21 = vmul.f32 -1.442695, %v497_v14  ;;  %v223_v12 = vld [vmem:[#allocation3] sm:$0x3] }
  0xec   : > { %1307 = vpow2.f32 %v1184_v20 }
  0xed   : > { %1309 = vpow2.f32 %v1185_v21 }
  0xf0   : > { %v1306_v23 = vpop.eup %1305 }
  0xf1   : > { %v456_v28 = vadd.f32 1.0, %v1306_v23 }
  0xf2   : > { %v1308_v29 = vpop.eup %1307 }
  0xf3   : > { %v1310_v31 = vpop.eup %1309  ;;  %1311 = vrcp.f32 %v456_v28  ;;  %v478_v33 = vadd.f32 1.0, %v1308_v29  ;;  %v468_v53 = vand.u32 2147483648, %v456_v28  ;;  %v466_v60 = vand.u32 2147483647, %v456_v28 }
  0xf4   : > { %v502_v36 = vadd.f32 1.0, %v1310_v31  ;;  %vm462_vm4 = vweird.f32 %v456_v28 }
  0xf5   : > { %1313 = vrcp.f32 %v478_v33  ;;  %v490_v61 = vand.u32 2147483648, %v478_v33  ;;  %v488_v1 = vand.u32 2147483647, %v478_v33  ;;  %v469_v2 = vor.u32 1.1754944e-38, %v468_v53 }
  0xf6   : > { %1315 = vrcp.f32 %v502_v36  ;;  %vm467_vm7 = vcmp.eq.f32.partialorder %v466_v60, 8.507059e+37  ;;  %vm484_vm8 = vweird.f32 %v478_v33  ;;  %vm508_vm12 = vweird.f32 %v502_v36 }
  0xf7   : > { %1317 = vtanh.f32 %v494_v42  ;;  %v491_v16 = vor.u32 1.1754944e-38, %v490_v61  ;;  %vm489_vm10 = vcmp.eq.f32.partialorder %v488_v1, 8.507059e+37 }
  0xf9   : > { %v1312_v37 = vpop.eup %1311 }
  0xfa   : > { %v458_v38 = vmul.f32 %v1312_v37, %v456_v28  ;;  %vm463_vm3 = vweird.f32 %v1312_v37 }
  0xfb   : > { %v1314_v40 = vpop.eup %1313  ;;  %vm464_vm6 = vmor %vm462_vm4, %vm463_vm3 }
  0xfc   : > { %v1316_v49 = vpop.eup %1315  ;;  %v459_v50 = vsub.f32 1.0, %v458_v38  ;;  %v480_v52 = vmul.f32 %v1314_v40, %v478_v33  ;;  %vm485_vm5 = vweird.f32 %v1314_v40  ;;  %v512_v33 = vand.u32 2147483647, %v502_v36 }
  0xfd   : > { %v504_v54 = vmul.f32 %v1316_v49, %v502_v36  ;;  %vm486_vm9 = vmor %vm484_vm8, %vm485_vm5  ;;  %v1318_v20 = vpop.eup %1317  ;;  %vm509_vm11 = vweird.f32 %v1316_v49 }
  0xfe   : > { %v481_v55 = vsub.f32 1.0, %v480_v52  ;;  %v460_v56 = vmul.f32 %v1312_v37, %v459_v50  ;;  %vm510_vm13 = vmor %vm508_vm12, %vm509_vm11  ;;  %vm513_vm14 = vcmp.eq.f32.partialorder %v512_v33, 8.507059e+37 }
  0xff   : > { %v505_v3 = vsub.f32 1.0, %v504_v54 }
 0x100   : > { %v461_v62 = vadd.f32 %v1312_v37, %v460_v56  ;;  %v482_v0 = vmul.f32 %v1314_v40, %v481_v55 }
 0x101   : > { %v506_v23 = vmul.f32 %v1316_v49, %v505_v3 }
 0x102   : > { %v465_v5 = vsel %vm464_vm6, %v1312_v37, %v461_v62  ;;  %v483_v11 = vadd.f32 %v1314_v40, %v482_v0  ;;  %v514_v37 = vand.u32 2147483648, %v502_v36 }
 0x103   : > { %v470_v14 = vsel %vm467_vm7, %v469_v2, %v465_v5  ;;  %v507_v38 = vadd.f32 %v1316_v49, %v506_v23 }
 0x104   : > { %v487_v19 = vsel %vm486_vm9, %v1314_v40, %v483_v11  ;;  %v519_v29 = vmul.f32 %v1318_v20, %v470_v14  ;;  %v515_v50 = vor.u32 1.1754944e-38, %v514_v37 }
 0x105   : > { %v492_v21 = vsel %vm489_vm10, %v491_v16, %v487_v19  ;;  %v511_v42 = vsel %vm510_vm13, %v1316_v49, %v507_v38 }
 0x106   : > { %v518_v28 = vmul.f32 %v492_v21, %v223_v12  ;;  %v516_v52 = vsel %vm513_vm14, %v515_v50, %v511_v42 }
 0x108   : > { %v1803_v31 = vadd.f32 %v519_v29, %v518_v28 }
 0x10a   : > { %1319 = vtanh.f32 %v1803_v31 }
 0x110   : > { %v1320_v40 = vpop.eup %1319 }
 0x111   : > { %v522_v53 = vmul.f32 %v1320_v40, %v516_v52 }
 0x113   : > { %523 = vst [vmem:[%s1635_s8] sm:$0x3] %v522_v53  ;;  %v526_v54 = vpack.c.bf16 %v522_v53, %v522_v53 }
 0x115   : > { %535 = vmatmul.bf16.vlgmr.msrb.gmra.mxu0 %v526_v54  ;;  %548 = vmatmul.bf16.vlgmr.msrb.gmra.mxu1 %v526_v54 }
 0x116   : > { %561 = vmatmul.bf16.vlgmr.msrb.gmra.mxu2 %v526_v54  ;;  %574 = vmatmul.bf16.vlgmr.msrb.gmra.mxu3 %v526_v54 }
 0x117   : > { %805 = vmatpush.bf16.msrb.mxu0 %v1639_v4  ;;  %818 = vmatpush.bf16.msrb.mxu1 %v1641_v8 }
 0x118   : > { %831 = vmatpush.bf16.msrb.mxu2 %v1643_v9  ;;  %844 = vmatpush.bf16.msrb.mxu3 %v1646_v13 }
 0x11b   : > { %806 = vmatpush.bf16.msrb.mxu0 %v1650_v17  ;;  %819 = vmatpush.bf16.msrb.mxu1 %v1652_v18 }
 0x11c   : > { %832 = vmatpush.bf16.msrb.mxu2 %v1655_v22  ;;  %845 = vmatpush.bf16.msrb.mxu3 %v1657_v26 }
 0x11f   : > { %807 = vmatpush.bf16.msrb.mxu0 %v1660_v30  ;;  %820 = vmatpush.bf16.msrb.mxu1 %v1664_v34  ;;  %v1186_v34 = vld [vmem:[%s1624_s14 + $0x8] sm:$0xff] }
 0x120   : > { %833 = vmatpush.bf16.msrb.mxu2 %v1666_v35  ;;  %846 = vmatpush.bf16.msrb.mxu3 %v1669_v39 }
 0x123   : > { %808 = vmatpush.bf16.msrb.mxu0 %v1672_v45  ;;  %821 = vmatpush.bf16.msrb.mxu1 %v1676_v46 }
 0x124   : > { %834 = vmatpush.bf16.msrb.mxu2 %v1678_v47  ;;  %847 = vmatpush.bf16.msrb.mxu3 %v1681_v51 }
 0x127   : > { %809 = vmatpush.bf16.msrb.mxu0 %v1684_v57  ;;  %822 = vmatpush.bf16.msrb.mxu1 %v1688_v58 }
 0x128   : > { %835 = vmatpush.bf16.msrb.mxu2 %v1690_v59  ;;  %848 = vmatpush.bf16.msrb.mxu3 %v1693_v63 }
 0x12b   : > { %810 = vmatpush.bf16.msrb.mxu0 %v1696_v6  ;;  %823 = vmatpush.bf16.msrb.mxu1 %v1700_v7 }
 0x12c   : > { %836 = vmatpush.bf16.msrb.mxu2 %v1702_v10  ;;  %849 = vmatpush.bf16.msrb.mxu3 %v1705_v15 }
 0x12f   : > { %811 = vmatpush.bf16.msrb.mxu0 %v1708_v24  ;;  %824 = vmatpush.bf16.msrb.mxu1 %v1712_v25 }
 0x130   : > { %837 = vmatpush.bf16.msrb.mxu2 %v1714_v27  ;;  %850 = vmatpush.bf16.msrb.mxu3 %v1717_v32 }
 0x133   : > { %812 = vmatpush.bf16.msrb.mxu0 %v1720_v41  ;;  %825 = vmatpush.bf16.msrb.mxu1 %v1724_v43 }
 0x134   : > { %838 = vmatpush.bf16.msrb.mxu2 %v1726_v44  ;;  %851 = vmatpush.bf16.msrb.mxu3 %v1729_v48 }
 0x192   : > { %v536_v4 = vpop.f32.mrf.mxu0  ;;  %v549_v8 = vpop.f32.mrf.mxu1 }
 0x193   : > { %v583_v9 = vrot.slane %v549_v8, 6 }
 0x195   : > { %v586_v35 = vsel %vm445_vm0, %v536_v4, %v583_v9 }
 0x199   : > { %v562_v13 = vpop.f32.mrf.mxu2  ;;  %v575_v17 = vpop.f32.mrf.mxu3 }
 0x19a   : > { %v584_v18 = vrot.slane %v562_v13, 4  ;;  %v585_v22 = vrot.slane %v575_v17, 2  ;;  %v538_v26 = vpop.f32.mrf.mxu0  ;;  %v551_v30 = vpop.f32.mrf.mxu1 }
 0x19c   : > { %v587_v39 = vsel %vm447_vm1, %v584_v18, %v585_v22 }
 0x19d   : > { %v588_v45 = vsel %vm449_vm2, %v586_v35, %v587_v39  ;;  %v1191_v35 = vld [vmem:[%s1624_s14 + $0x10] sm:$0xff] }
 0x19e   : > { %v590_v46 = vadd.f32 %v1186_v34, %v588_v45 }
 0x1a0   : > { %v1187_v47 = vmul.f32 -1.442695, %v590_v46  ;;  %v611_v51 = vrot.slane %v590_v46, 2  ;;  %v635_v57 = vrot.slane %v590_v46, 6  ;;  %v632_v44 = vrot.slane %v590_v46, 4 }
 0x1a1   : > { %v564_v58 = vpop.f32.mrf.mxu2  ;;  %v577_v59 = vpop.f32.mrf.mxu3 }
 0x1a2   : > { %1321 = vpow2.f32 %v1187_v47  ;;  %v1188_v63 = vmul.f32 -1.442695, %v611_v51  ;;  %v1189_v6 = vmul.f32 -1.442695, %v635_v57 }
 0x1a4   : > { %1323 = vpow2.f32 %v1188_v63 }
 0x1a5   : > { %1325 = vpow2.f32 %v1189_v6 }
 0x1a8   : > { %v1322_v7 = vpop.eup %1321 }
 0x1a9   : > { %v594_v10 = vadd.f32 1.0, %v1322_v7 }
 0x1aa   : > { %v1324_v15 = vpop.eup %1323 }
 0x1ab   : > { %v1326_v24 = vpop.eup %1325  ;;  %1327 = vrcp.f32 %v594_v10  ;;  %v616_v25 = vadd.f32 1.0, %v1324_v15  ;;  %v606_v55 = vand.u32 2147483648, %v594_v10  ;;  %v604_v62 = vand.u32 2147483647, %v594_v10 }
 0x1ac   : > { %v640_v27 = vadd.f32 1.0, %v1326_v24  ;;  %vm600_vm3 = vweird.f32 %v594_v10 }
 0x1ad   : > { %1329 = vrcp.f32 %v616_v25  ;;  %v628_v0 = vand.u32 2147483648, %v616_v25  ;;  %v626_v3 = vand.u32 2147483647, %v616_v25  ;;  %v607_v5 = vor.u32 1.1754944e-38, %v606_v55 }
 0x1ae   : > { %1331 = vrcp.f32 %v640_v27  ;;  %vm605_vm6 = vcmp.eq.f32.partialorder %v604_v62, 8.507059e+37  ;;  %vm622_vm7 = vweird.f32 %v616_v25  ;;  %v652_v42 = vand.u32 2147483648, %v640_v27 }
 0x1af   : > { %1333 = vtanh.f32 %v632_v44  ;;  %v629_v19 = vor.u32 1.1754944e-38, %v628_v0  ;;  %vm627_vm9 = vcmp.eq.f32.partialorder %v626_v3, 8.507059e+37  ;;  %vm646_vm11 = vweird.f32 %v640_v27 }
 0x1b0   : > { %v650_v50 = vand.u32 2147483647, %v640_v27  ;;  %v653_v52 = vor.u32 1.1754944e-38, %v652_v42 }
 0x1b1   : > { %v1328_v32 = vpop.eup %1327 }
 0x1b2   : > { %v596_v41 = vmul.f32 %v1328_v32, %v594_v10  ;;  %vm601_vm15 = vweird.f32 %v1328_v32  ;;  %vm651_vm13 = vcmp.eq.f32.partialorder %v650_v50, 8.507059e+37 }
 0x1b3   : > { %v1330_v43 = vpop.eup %1329  ;;  %vm602_vm5 = vmor %vm600_vm3, %vm601_vm15 }
 0x1b4   : > { %v1332_v48 = vpop.eup %1331  ;;  %v597_v36 = vsub.f32 1.0, %v596_v41  ;;  %v618_v49 = vmul.f32 %v1330_v43, %v616_v25  ;;  %vm623_vm4 = vweird.f32 %v1330_v43 }
 0x1b5   : > { %v642_v56 = vmul.f32 %v1332_v48, %v640_v27  ;;  %vm624_vm8 = vmor %vm622_vm7, %vm623_vm4  ;;  %v1334_v21 = vpop.eup %1333  ;;  %vm647_vm10 = vweird.f32 %v1332_v48 }
 0x1b6   : > { %v619_v60 = vsub.f32 1.0, %v618_v49  ;;  %v598_v61 = vmul.f32 %v1328_v32, %v597_v36  ;;  %vm648_vm12 = vmor %vm646_vm11, %vm647_vm10 }
 0x1b7   : > { %v643_v11 = vsub.f32 1.0, %v642_v56 }
 0x1b8   : > { %v599_v1 = vadd.f32 %v1328_v32, %v598_v61  ;;  %v620_v2 = vmul.f32 %v1330_v43, %v619_v60 }
 0x1b9   : > { %v644_v28 = vmul.f32 %v1332_v48, %v643_v11 }
 0x1ba   : > { %v603_v12 = vsel %vm602_vm5, %v1328_v32, %v599_v1  ;;  %v621_v14 = vadd.f32 %v1330_v43, %v620_v2 }
 0x1bb   : > { %v608_v16 = vsel %vm605_vm6, %v607_v5, %v603_v12  ;;  %v645_v33 = vadd.f32 %v1332_v48, %v644_v28 }
 0x1bc   : > { %v625_v20 = vsel %vm624_vm8, %v1330_v43, %v621_v14  ;;  %v657_v38 = vmul.f32 %v1334_v21, %v608_v16 }
 0x1bd   : > { %v630_v23 = vsel %vm627_vm9, %v629_v19, %v625_v20  ;;  %v649_v40 = vsel %vm648_vm12, %v1332_v48, %v645_v33 }
 0x1be   : > { %v656_v29 = vmul.f32 %v630_v23, %v1803_v31  ;;  %v654_v54 = vsel %vm651_vm13, %v653_v52, %v649_v40 }
 0x1c0   : > { %v1844_v37 = vadd.f32 %v657_v38, %v656_v29 }
 0x1c2   : > { %1335 = vtanh.f32 %v1844_v37 }
 0x1c8   : > { %v1336_v53 = vpop.eup %1335 }
 0x1c9   : > { %v660_v4 = vmul.f32 %v1336_v53, %v654_v54 }
 0x1cb   : > { %1190 = vst [vmem:[%s1635_s8 + $0x2] sm:$0x3] %v660_v4  ;;  %v665_v31 = vpack.c.bf16 %v660_v4, %v660_v4 }
 0x1cd   : > { %674 = vmatmul.bf16.vlgmr.msra.gmra.mxu0 %v665_v31  ;;  %687 = vmatmul.bf16.vlgmr.msra.gmra.mxu1 %v665_v31 }
 0x1ce   : > { %700 = vmatmul.bf16.vlgmr.msra.gmra.mxu2 %v665_v31  ;;  %713 = vmatmul.bf16.vlgmr.msra.gmra.mxu3 %v665_v31 }
 0x24a   : > { %v675_v8 = vpop.f32.mrf.mxu0  ;;  %v688_v9 = vpop.f32.mrf.mxu1 }
 0x24b   : > { %v722_v13 = vrot.slane %v688_v9, 6 }
 0x24d   : > { %v725_v39 = vsel %vm445_vm0, %v675_v8, %v722_v13 }
 0x251   : > { %v701_v17 = vpop.f32.mrf.mxu2  ;;  %v714_v18 = vpop.f32.mrf.mxu3 }
 0x252   : > { %v723_v22 = vrot.slane %v701_v17, 4  ;;  %v724_v26 = vrot.slane %v714_v18, 2  ;;  %v677_v30 = vpop.f32.mrf.mxu0  ;;  %v690_v34 = vpop.f32.mrf.mxu1 }
 0x254   : > { %v726_v45 = vsel %vm447_vm1, %v723_v22, %v724_v26 }
 0x255   : > { %v727_v46 = vsel %vm449_vm2, %v725_v39, %v726_v45  ;;  %v1196_v39 = vld [vmem:[%s1624_s14 + $0x18] sm:$0xff] }
 0x256   : > { %v729_v47 = vadd.f32 %v1191_v35, %v727_v46 }
 0x258   : > { %v1192_v51 = vmul.f32 -1.442695, %v729_v47  ;;  %v750_v57 = vrot.slane %v729_v47, 2  ;;  %v774_v58 = vrot.slane %v729_v47, 6  ;;  %v771_v48 = vrot.slane %v729_v47, 4 }
 0x259   : > { %v703_v59 = vpop.f32.mrf.mxu2  ;;  %v716_v63 = vpop.f32.mrf.mxu3 }
 0x25a   : > { %1337 = vpow2.f32 %v1192_v51  ;;  %v1193_v6 = vmul.f32 -1.442695, %v750_v57  ;;  %v1194_v7 = vmul.f32 -1.442695, %v774_v58 }
 0x25c   : > { %1339 = vpow2.f32 %v1193_v6 }
 0x25d   : > { %1341 = vpow2.f32 %v1194_v7 }
 0x260   : > { %v1338_v10 = vpop.eup %1337 }
 0x261   : > { %v733_v15 = vadd.f32 1.0, %v1338_v10 }
 0x262   : > { %v1340_v24 = vpop.eup %1339 }
 0x263   : > { %v1342_v25 = vpop.eup %1341  ;;  %1343 = vrcp.f32 %v733_v15  ;;  %v755_v27 = vadd.f32 1.0, %v1340_v24  ;;  %v745_v56 = vand.u32 2147483648, %v733_v15  ;;  %v743_v0 = vand.u32 2147483647, %v733_v15 }
 0x264   : > { %v779_v32 = vadd.f32 1.0, %v1342_v25  ;;  %vm739_vm15 = vweird.f32 %v733_v15 }
 0x265   : > { %1345 = vrcp.f32 %v755_v27  ;;  %v767_v1 = vand.u32 2147483648, %v755_v27  ;;  %v765_v5 = vand.u32 2147483647, %v755_v27  ;;  %v746_v11 = vor.u32 1.1754944e-38, %v745_v56 }
 0x266   : > { %1347 = vrcp.f32 %v779_v32  ;;  %vm744_vm5 = vcmp.eq.f32.partialorder %v743_v0, 8.507059e+37  ;;  %vm761_vm6 = vweird.f32 %v755_v27  ;;  %v791_v40 = vand.u32 2147483648, %v779_v32 }
 0x267   : > { %1349 = vtanh.f32 %v771_v48  ;;  %v768_v20 = vor.u32 1.1754944e-38, %v767_v1  ;;  %vm766_vm8 = vcmp.eq.f32.partialorder %v765_v5, 8.507059e+37  ;;  %vm785_vm10 = vweird.f32 %v779_v32 }
 0x268   : > { %v789_v52 = vand.u32 2147483647, %v779_v32  ;;  %v792_v54 = vor.u32 1.1754944e-38, %v791_v40 }
 0x269   : > { %v1344_v41 = vpop.eup %1343 }
 0x26a   : > { %v735_v43 = vmul.f32 %v1344_v41, %v733_v15  ;;  %vm740_vm14 = vweird.f32 %v1344_v41  ;;  %vm790_vm12 = vcmp.eq.f32.partialorder %v789_v52, 8.507059e+37 }
 0x26b   : > { %v1346_v44 = vpop.eup %1345  ;;  %vm741_vm4 = vmor %vm739_vm15, %vm740_vm14 }
 0x26c   : > { %v1348_v36 = vpop.eup %1347  ;;  %v736_v49 = vsub.f32 1.0, %v735_v43  ;;  %v757_v55 = vmul.f32 %v1346_v44, %v755_v27  ;;  %vm762_vm3 = vweird.f32 %v1346_v44 }
 0x26d   : > { %v781_v60 = vmul.f32 %v1348_v36, %v779_v32  ;;  %vm763_vm7 = vmor %vm761_vm6, %vm762_vm3  ;;  %v1350_v23 = vpop.eup %1349  ;;  %vm786_vm9 = vweird.f32 %v1348_v36 }
 0x26e   : > { %v758_v61 = vsub.f32 1.0, %v757_v55  ;;  %v737_v62 = vmul.f32 %v1344_v41, %v736_v49  ;;  %vm787_vm11 = vmor %vm785_vm10, %vm786_vm9 }
 0x26f   : > { %v782_v12 = vsub.f32 1.0, %v781_v60 }
 0x270   : > { %v738_v2 = vadd.f32 %v1344_v41, %v737_v62  ;;  %v759_v3 = vmul.f32 %v1346_v44, %v758_v61 }
 0x271   : > { %v783_v29 = vmul.f32 %v1348_v36, %v782_v12 }
 0x272   : > { %v742_v14 = vsel %vm741_vm4, %v1344_v41, %v738_v2  ;;  %v760_v16 = vadd.f32 %v1346_v44, %v759_v3 }
 0x273   : > { %v747_v19 = vsel %vm744_vm5, %v746_v11, %v742_v14  ;;  %v784_v50 = vadd.f32 %v1348_v36, %v783_v29 }
 0x274   : > { %v764_v21 = vsel %vm763_vm7, %v1346_v44, %v760_v16  ;;  %v796_v33 = vmul.f32 %v1350_v23, %v747_v19 }
 0x275   : > { %v769_v28 = vsel %vm766_vm8, %v768_v20, %v764_v21  ;;  %v788_v53 = vsel %vm787_vm11, %v1348_v36, %v784_v50 }
 0x276   : > { %v795_v38 = vmul.f32 %v769_v28, %v1844_v37  ;;  %v793_v31 = vsel %vm790_vm12, %v792_v54, %v788_v53 }
 0x278   : > { %v1853_v42 = vadd.f32 %v796_v33, %v795_v38 }
 0x27a   : > { %1351 = vtanh.f32 %v1853_v42 }
 0x280   : > { %v1352_v4 = vpop.eup %1351 }
 0x281   : > { %v799_v8 = vmul.f32 %v1352_v4, %v793_v31 }
 0x283   : > { %1195 = vst [vmem:[%s1635_s8 + $0x4] sm:$0x3] %v799_v8  ;;  %v804_v37 = vpack.c.bf16 %v799_v8, %v799_v8 }
 0x285   : > { %813 = vmatmul.bf16.vlgmr.msrb.gmra.mxu0 %v804_v37  ;;  %826 = vmatmul.bf16.vlgmr.msrb.gmra.mxu1 %v804_v37 }
 0x286   : > { %839 = vmatmul.bf16.vlgmr.msrb.gmra.mxu2 %v804_v37  ;;  %852 = vmatmul.bf16.vlgmr.msrb.gmra.mxu3 %v804_v37 }
 0x302   : > { %v814_v9 = vpop.f32.mrf.mxu0  ;;  %v827_v13 = vpop.f32.mrf.mxu1 }
 0x303   : > { %v861_v17 = vrot.slane %v827_v13, 6 }
 0x305   : > { %v864_v45 = vsel %vm445_vm0, %v814_v9, %v861_v17 }
 0x309   : > { %v840_v18 = vpop.f32.mrf.mxu2  ;;  %v853_v22 = vpop.f32.mrf.mxu3 }
 0x30a   : > { %v862_v26 = vrot.slane %v840_v18, 4  ;;  %v863_v30 = vrot.slane %v853_v22, 2  ;;  %v816_v34 = vpop.f32.mrf.mxu0  ;;  %v829_v35 = vpop.f32.mrf.mxu1 }
 0x30c   : > { %v865_v46 = vsel %vm447_vm1, %v862_v26, %v863_v30 }
 0x30d   : > { %v866_v47 = vsel %vm449_vm2, %v864_v45, %v865_v46 }
 0x30e   : > { %v868_v51 = vadd.f32 %v1196_v39, %v866_v47 }
 0x310   : > { %v1197_v57 = vmul.f32 -1.442695, %v868_v51  ;;  %v889_v58 = vrot.slane %v868_v51, 2  ;;  %v913_v59 = vrot.slane %v868_v51, 6  ;;  %v910_v49 = vrot.slane %v868_v51, 4 }
 0x311   : > { %v842_v63 = vpop.f32.mrf.mxu2  ;;  %v855_v6 = vpop.f32.mrf.mxu3 }
 0x312   : > { %1353 = vpow2.f32 %v1197_v57  ;;  %v1198_v7 = vmul.f32 -1.442695, %v889_v58  ;;  %v1199_v10 = vmul.f32 -1.442695, %v913_v59 }
 0x314   : > { %1355 = vpow2.f32 %v1198_v7 }
 0x315   : > { %1357 = vpow2.f32 %v1199_v10 }
 0x318   : > { %v1354_v15 = vpop.eup %1353 }
 0x319   : > { %v872_v24 = vadd.f32 1.0, %v1354_v15 }
 0x31a   : > { %v1356_v25 = vpop.eup %1355 }
 0x31b   : > { %v1358_v27 = vpop.eup %1357  ;;  %1359 = vrcp.f32 %v872_v24  ;;  %v894_v32 = vadd.f32 1.0, %v1356_v25  ;;  %v884_v61 = vand.u32 2147483648, %v872_v24  ;;  %v882_v0 = vand.u32 2147483647, %v872_v24 }
 0x31c   : > { %v918_v41 = vadd.f32 1.0, %v1358_v27  ;;  %vm878_vm1 = vweird.f32 %v872_v24 }
 0x31d   : > { %1361 = vrcp.f32 %v894_v32  ;;  %v906_v3 = vand.u32 2147483648, %v894_v32  ;;  %v904_v11 = vand.u32 2147483647, %v894_v32  ;;  %v885_v14 = vor.u32 1.1754944e-38, %v884_v61 }
 0x31e   : > { %1363 = vrcp.f32 %v918_v41  ;;  %vm883_vm14 = vcmp.eq.f32.partialorder %v882_v0, 8.507059e+37  ;;  %vm900_vm15 = vweird.f32 %v894_v32  ;;  %v930_v53 = vand.u32 2147483648, %v918_v41 }
 0x31f   : > { %1365 = vtanh.f32 %v910_v49  ;;  %v907_v21 = vor.u32 1.1754944e-38, %v906_v3  ;;  %vm905_vm4 = vcmp.eq.f32.partialorder %v904_v11, 8.507059e+37  ;;  %vm924_vm6 = vweird.f32 %v918_v41 }
 0x320   : > { %v928_v54 = vand.u32 2147483647, %v918_v41 }
 0x321   : > { %v1360_v43 = vpop.eup %1359 }
 0x322   : > { %v874_v44 = vmul.f32 %v1360_v43, %v872_v24  ;;  %vm879_vm0 = vweird.f32 %v1360_v43  ;;  %vm929_vm8 = vcmp.eq.f32.partialorder %v928_v54, 8.507059e+37 }
 0x323   : > { %v1362_v48 = vpop.eup %1361  ;;  %vm880_vm2 = vmor %vm878_vm1, %vm879_vm0 }
 0x324   : > { %v875_v36 = vsub.f32 1.0, %v874_v44  ;;  %v1364_v55 = vpop.eup %1363  ;;  %v896_v56 = vmul.f32 %v1362_v48, %v894_v32  ;;  %vm901_vm13 = vweird.f32 %v1362_v48 }
 0x325   : > { %v920_v62 = vmul.f32 %v1364_v55, %v918_v41  ;;  %vm902_vm3 = vmor %vm900_vm15, %vm901_vm13  ;;  %v1366_v28 = vpop.eup %1365  ;;  %vm925_vm5 = vweird.f32 %v1364_v55 }
 0x326   : > { %v876_v60 = vmul.f32 %v1360_v43, %v875_v36  ;;  %v897_v1 = vsub.f32 1.0, %v896_v56  ;;  %vm926_vm7 = vmor %vm924_vm6, %vm925_vm5 }
 0x327   : > { %v921_v16 = vsub.f32 1.0, %v920_v62 }
 0x328   : > { %v877_v2 = vadd.f32 %v1360_v43, %v876_v60  ;;  %v898_v5 = vmul.f32 %v1362_v48, %v897_v1 }
 0x329   : > { %v922_v38 = vmul.f32 %v1364_v55, %v921_v16 }
 0x32a   : > { %v881_v12 = vsel %vm880_vm2, %v1360_v43, %v877_v2  ;;  %v899_v19 = vadd.f32 %v1362_v48, %v898_v5 }
 0x32b   : > { %v886_v20 = vsel %vm883_vm14, %v885_v14, %v881_v12  ;;  %v923_v52 = vadd.f32 %v1364_v55, %v922_v38 }
 0x32c   : > { %v903_v23 = vsel %vm902_vm3, %v1362_v48, %v899_v19  ;;  %v935_v50 = vmul.f32 %v1366_v28, %v886_v20 }
 0x32d   : > { %v908_v29 = vsel %vm905_vm4, %v907_v21, %v903_v23  ;;  %v927_v4 = vsel %vm926_vm7, %v1364_v55, %v923_v52 }
 0x32e   : > { %v934_v33 = vmul.f32 %v908_v29, %v1853_v42  ;;  %v931_v42 = vor.u32 1.1754944e-38, %v930_v53 }
 0x330   : > { %v936_v40 = vadd.f32 %v935_v50, %v934_v33  ;;  %v932_v8 = vsel %vm929_vm8, %v931_v42, %v927_v4 }
 0x332   : > { %1367 = vtanh.f32 %v936_v40  ;;  %942 = vst [vmem:[#allocation3] sm:$0x3] %v936_v40 }
 0x338   : > { %v1368_v31 = vpop.eup %1367 }
 0x339   : > { %v938_v37 = vmul.f32 %v1368_v31, %v932_v8 }
 0x33b   : > { %1200 = vst [vmem:[%s1635_s8 + $0x6] sm:$0x3] %v938_v37 }
 0x33c   : > { %941 = vst [vmem:[#allocation2] sm:$0x3] %v938_v37 }
 0x33d   : > { %1456 = shalt.err (!%p1453_p13)
}
 0x33e   : > { %s1507_s5 = smov 32   ;;  %s1508_s6 = smov 2  }
 0x33f   : > { %1247 = dma.vmem_to_hbm [thread:$0]  (%p1592_p10), %s957_s21, 128, %s959_s22, %s944_s13, %s1507_s5, %s1507_s5, %s1508_s6  }
 0x340 PF: > { %s973_s7 = sand.u32 1, %s1487_s9   ;;  %p1906_p0 = scmp.ge.s32.totalorder %s1499_s12, 2 }
 0x341   : > { %s974_s14 = scalar_lea.sflag [#allocation6], %s973_s7 }
 0x342   : > { %p1258_p3 = pnand %p1906_p0, %p1559_p6 }
 0x344   : > { %p1259_p5 = pneg %p1258_p3 }
 0x346   : > { %1482 = dma.done.wait (%p1259_p5), %s974_s14, 128  }
 0x347   : > { %1484 = vsyncadd (%p1259_p5), %s974_s14, 4294967168  ;;  %p16_p7 = scmp.ge.s32.totalorder %s1578_s23, 4   ;;  %s1907_s9 = smov %s1491_s10 }
 0x348   : > { %s1908_s10 = smov %s1495_s11  ;;  %s1909_s11 = smov %s1588_s28 }
 0x349   : > { %s1910_s12 = smov %s1578_s23  ;;  %18 = sbr.rel (!%p16_p7) target bundleno = 6 (0x6), region = 87 }
 0x34e   :  { %980 = vsyncpa [#allocation5], 1 }
 0x34f   :  { %982 = vsyncpa [#allocation5 + $0x1], 1 }
 0x350   :  { %983 = vsyncpa [#allocation8], 1 }
 0x351   :  { %984 = vsyncpa [#allocation6], 1 }
 0x352   :  { %986 = vsyncpa [#allocation6 + $0x1], 1 }

</bundles_post_ra>
